<compile_context>
chip_gen: v6e
topology: v6e:2x2x1
jax: 0.10.0
libtpu: 0.0.40
codegen_flags: <defaults>
</compile_context>

<pallas_src>
import functools
import math

import jax
import jax.numpy as jnp
from jax import lax
from jax.experimental import pallas as pl
from jax.experimental.pallas import tpu as pltpu


_VMEM = pl.BlockSpec(memory_space=pltpu.MemorySpace.VMEM)


# ----------------------------------------------------------------------------
# In-kernel building blocks (pure functions on VMEM-resident arrays)
# ----------------------------------------------------------------------------

def _head_sizes(output_size, heads):
    mat_out = output_size // heads
    return [mat_out] * (heads - 1) + [output_size - mat_out * (heads - 1)]


def _self_attention_body(x, wqkv, wout, output_size, heads):
    """Fused SelfAttention on VMEM arrays.

    x:    [t, D_in]
    wqkv: [D_in, 3*output_size]  (columns: Q heads | K heads | V heads)
    wout: [output_size, D_in]
    Returns (y [t, D_in], att_last_head [t, t]).
    """
    # Single fused QKV projection for every head at once.
    proj = jnp.dot(x, wqkv, preferred_element_type=jnp.float32)  # [t, 3*out]
    q_all = proj[:, 0:output_size]
    k_all = proj[:, output_size:2 * output_size]
    v_all = proj[:, 2 * output_size:3 * output_size]

    ys = []
    att = None
    off = 0
    for dh in _head_sizes(output_size, heads):
        q = q_all[:, off:off + dh]
        k = k_all[:, off:off + dh]
        v = v_all[:, off:off + dh]
        # Q @ K^T via dot_general contracting the last dim of both operands
        # (no explicit transpose). No 1/sqrt(dh) scaling -- faithful to PGL-SUM.
        energies = lax.dot_general(q, k, (((1,), (1,)), ((), ())),
                                   preferred_element_type=jnp.float32)
        # softmax(dim=-1)
        m = jnp.max(energies, axis=-1, keepdims=True)
        p = jnp.exp(energies - m)
        att = p * pl.reciprocal(jnp.sum(p, axis=-1, keepdims=True), approx=False)
        # Dropout(p=0.5) -> identity in eval mode.
        ys.append(jnp.dot(att, v, preferred_element_type=jnp.float32))
        off += dh

    y_concat = jnp.concatenate(ys, axis=1) if len(ys) > 1 else ys[0]
    y = jnp.dot(y_concat, wout, preferred_element_type=jnp.float32)
    # att is the LAST head's attention weights (reference loop quirk).
    return y, att


def _l2_normalize(v):
    """F.normalize(v, p=2, dim=1): v / max(||v||_2, 1e-12), via EUP rsqrt."""
    ss = jnp.sum(v * v, axis=1, keepdims=True)
    return v * lax.rsqrt(jnp.maximum(ss, 1e-24))


# ----------------------------------------------------------------------------
# The single fused kernel
# ----------------------------------------------------------------------------

def _multi_attention_kernel(x_ref, g_wqkv_ref, g_wout_ref, l_wqkv_ref, l_wout_ref,
                            y_ref, att_ref, *, T, output_size, heads,
                            local_output_size, local_heads, num_segments, fusion):
    x = x_ref[...]

    # ---- global multi-head attention (all heads + out-projection) ----------
    y_global, att = _self_attention_body(
        x, g_wqkv_ref[...], g_wout_ref[...], output_size, heads)
    att_ref[...] = att.astype(att_ref.dtype)

    if num_segments is None or fusion is None:
        y_ref[...] = y_global.astype(y_ref.dtype)
        return

    # ---- per-segment local attention + normalize/fuse epilogue (in VMEM) ---
    segment_size = math.ceil(T / num_segments)
    pieces = []
    for s in range(num_segments):
        left = s * segment_size
        right = min((s + 1) * segment_size, T)
        local_x = x[left:right, :]
        y_local, _ = _self_attention_body(
            local_x, l_wqkv_ref[s], l_wout_ref[s], local_output_size, local_heads)
        g = _l2_normalize(y_global[left:right, :])
        l = _l2_normalize(y_local)
        if fusion == "add":
            fused = g + l
        elif fusion == "mult":
            fused = g * l
        elif fusion == "avg":
            fused = (g + l) * 0.5
        elif fusion == "max":
            fused = jnp.maximum(g, l)
        else:
            raise NotImplementedError(fusion)
        pieces.append(fused)

    y_full = jnp.concatenate(pieces, axis=0) if len(pieces) > 1 else pieces[0]
    y_ref[...] = y_full.astype(y_ref.dtype)  # one lane/sublane-dense store


# ----------------------------------------------------------------------------
# Wrapper
# ----------------------------------------------------------------------------

def multi_attention_forward(x, params, *, output_size, heads,
                            local_output_size, local_heads,
                            num_segments, fusion):
    """x: [T, input_size] -> (weighted_value [T, input_size], att [T, T])."""
    T, D = x.shape
    kernel = functools.partial(
        _multi_attention_kernel, T=T, output_size=output_size, heads=heads,
        local_output_size=local_output_size, local_heads=local_heads,
        num_segments=num_segments, fusion=fusion)
    return pl.pallas_call(
        kernel,
        out_shape=(jax.ShapeDtypeStruct((T, D), jnp.float32),
                   jax.ShapeDtypeStruct((T, T), jnp.float32)),
        in_specs=[_VMEM] * 5,
        out_specs=(_VMEM, _VMEM),
    )(x, params["g_wqkv"], params["g_wout"], params["l_wqkv"], params["l_wout"])


# ----------------------------------------------------------------------------
# Parameter init (deterministic, mirrors nn.Linear(bias=False) init)
# ----------------------------------------------------------------------------

def _linear_weight(key, in_features, out_features):
    """U(-1/sqrt(in), 1/sqrt(in)), stored pre-transposed as [in, out]."""
    bound = 1.0 / math.sqrt(in_features)
    return jax.random.uniform(key, (in_features, out_features),
                              dtype=jnp.float32, minval=-bound, maxval=bound)


def init_self_attention(key, input_size, output_size, heads):
    """Returns (Wqkv [in, 3*output_size], Wout [output_size, in])."""
    head_sizes = _head_sizes(output_size, heads)
    keys = jax.random.split(key, 3 * heads + 1)
    Wk, Wq, Wv = [], [], []
    for h, dh in enumerate(head_sizes):
        Wk.append(_linear_weight(keys[3 * h + 0], input_size, dh))
        Wq.append(_linear_weight(keys[3 * h + 1], input_size, dh))
        Wv.append(_linear_weight(keys[3 * h + 2], input_size, dh))
    Wout = _linear_weight(keys[-1], output_size, input_size)
    wqkv = jnp.concatenate(Wq + Wk + Wv, axis=1)  # [in, 3*output_size]
    return wqkv, Wout


def init_multi_attention(key, input_size, output_size, heads, num_segments):
    k_glob, k_loc = jax.random.split(key)
    g_wqkv, g_wout = init_self_attention(k_glob, input_size, output_size, heads)
    local_out = output_size // num_segments
    loc_keys = jax.random.split(k_loc, num_segments)
    l_wqkv, l_wout = [], []
    for s in range(num_segments):
        wqkv_s, wout_s = init_self_attention(loc_keys[s], input_size, local_out, heads)
        l_wqkv.append(wqkv_s)
        l_wout.append(wout_s)
    return {
        "g_wqkv": g_wqkv,                      # [in, 3*output_size]
        "g_wout": g_wout,                      # [output_size, in]
        "l_wqkv": jnp.stack(l_wqkv, axis=0),   # [S, in, 3*local_out]
        "l_wout": jnp.stack(l_wout, axis=0),   # [S, local_out, in]
    }


# ----------------------------------------------------------------------------
# Main
# ----------------------------------------------------------------------------

if __name__ == "__main__":
    T = 8
    INPUT_SIZE = 32
    OUTPUT_SIZE = 32
    HEADS = 2
    NUM_SEGMENTS = 2
    FUSION = "add"

    root = jax.random.PRNGKey(0)
    k_x, k_w = jax.random.split(root)

    x = jax.random.normal(k_x, (T, INPUT_SIZE), dtype=jnp.float32)
    params = init_multi_attention(k_w, INPUT_SIZE, OUTPUT_SIZE, HEADS, NUM_SEGMENTS)

    weighted_value, attn_weights = multi_attention_forward(
        x, params,
        output_size=OUTPUT_SIZE, heads=HEADS,
        local_output_size=OUTPUT_SIZE // NUM_SEGMENTS, local_heads=HEADS,
        num_segments=NUM_SEGMENTS, fusion=FUSION)

    jax.block_until_ready((weighted_value, attn_weights))

    assert weighted_value.shape == (T, INPUT_SIZE)
    assert attn_weights.shape == (T, T)
    assert bool(jnp.all(jnp.isfinite(weighted_value)))
    assert bool(jnp.all(jnp.isfinite(attn_weights)))

    print("KERNEL_OK")
</pallas_src>

<mosaic_0001>
module attributes {stable_mosaic.version = 11 : i64} {
  func.func @_multi_attention_kernel(%arg0: memref<8x32xf32, #tpu.memory_space<vmem>>, %arg1: memref<32x96xf32, #tpu.memory_space<vmem>>, %arg2: memref<32x32xf32, #tpu.memory_space<vmem>>, %arg3: memref<2x32x48xf32, #tpu.memory_space<vmem>>, %arg4: memref<2x16x32xf32, #tpu.memory_space<vmem>>, %arg5: memref<8x32xf32, #tpu.memory_space<vmem>>, %arg6: memref<8x8xf32, #tpu.memory_space<vmem>>) attributes {dimension_semantics = [], scalar_prefetch = 0 : i64, scratch_operands = 0 : i64, tpu.core_type = #tpu.core_type<tc>} {
    %c0 = arith.constant 0 : index
    %c0_0 = arith.constant 0 : index
    %0 = vector.load %arg0[%c0, %c0_0] : memref<8x32xf32, #tpu.memory_space<vmem>>, vector<8x32xf32>
    %c0_1 = arith.constant 0 : index
    %c0_2 = arith.constant 0 : index
    %1 = vector.load %arg1[%c0_1, %c0_2] : memref<32x96xf32, #tpu.memory_space<vmem>>, vector<32x96xf32>
    %c0_3 = arith.constant 0 : index
    %c0_4 = arith.constant 0 : index
    %2 = vector.load %arg2[%c0_3, %c0_4] : memref<32x32xf32, #tpu.memory_space<vmem>>, vector<32x32xf32>
    %cst = arith.constant dense<0.000000e+00> : vector<8x96xf32>
    %3 = tpu.matmul %0, %1, %cst {dimension_numbers = #tpu.dot_dimension_numbers<[1], [0], [0], [1], [0, 0, 1, 1], [], []>} : vector<8x32xf32>, vector<32x96xf32>, vector<8x96xf32> -> vector<8x96xf32>
    %4 = vector.extract_strided_slice %3 {offsets = [0, 0], sizes = [8, 32], strides = [1, 1]} : vector<8x96xf32> to vector<8x32xf32>
    %5 = vector.extract_strided_slice %3 {offsets = [0, 32], sizes = [8, 32], strides = [1, 1]} : vector<8x96xf32> to vector<8x32xf32>
    %6 = vector.extract_strided_slice %3 {offsets = [0, 64], sizes = [8, 32], strides = [1, 1]} : vector<8x96xf32> to vector<8x32xf32>
    %7 = vector.extract_strided_slice %4 {offsets = [0, 0], sizes = [8, 16], strides = [1, 1]} : vector<8x32xf32> to vector<8x16xf32>
    %8 = vector.extract_strided_slice %5 {offsets = [0, 0], sizes = [8, 16], strides = [1, 1]} : vector<8x32xf32> to vector<8x16xf32>
    %9 = vector.extract_strided_slice %6 {offsets = [0, 0], sizes = [8, 16], strides = [1, 1]} : vector<8x32xf32> to vector<8x16xf32>
    %cst_5 = arith.constant dense<0.000000e+00> : vector<8x8xf32>
    %10 = tpu.matmul %7, %8, %cst_5 {dimension_numbers = #tpu.dot_dimension_numbers<[1], [1], [0], [0], [0, 0, 1, 0], [], []>} : vector<8x16xf32>, vector<8x16xf32>, vector<8x8xf32> -> vector<8x8xf32>
    %cst_6 = arith.constant dense<0xFF800000> : vector<8xf32>
    %11 = vector.multi_reduction <maximumf>, %10, %cst_6 [1] : vector<8x8xf32> to vector<8xf32>
    %12 = vector.shape_cast %11 : vector<8xf32> to vector<8x1xf32>
    %13 = vector.broadcast %12 : vector<8x1xf32> to vector<8x8xf32>
    %14 = arith.subf %10, %13 : vector<8x8xf32>
    %15 = math.exp %14 : vector<8x8xf32>
    %cst_7 = arith.constant dense<0.000000e+00> : vector<8xf32>
    %16 = vector.multi_reduction <add>, %15, %cst_7 [1] : vector<8x8xf32> to vector<8xf32>
    %17 = vector.shape_cast %16 : vector<8xf32> to vector<8x1xf32>
    %18 = tpu.reciprocal %17 : vector<8x1xf32> -> vector<8x1xf32>
    %19 = vector.broadcast %18 : vector<8x1xf32> to vector<8x8xf32>
    %20 = arith.mulf %15, %19 : vector<8x8xf32>
    %cst_8 = arith.constant dense<0.000000e+00> : vector<8x16xf32>
    %21 = tpu.matmul %20, %9, %cst_8 {dimension_numbers = #tpu.dot_dimension_numbers<[1], [0], [0], [1], [0, 0, 1, 1], [], []>} : vector<8x8xf32>, vector<8x16xf32>, vector<8x16xf32> -> vector<8x16xf32>
    %22 = vector.extract_strided_slice %4 {offsets = [0, 16], sizes = [8, 16], strides = [1, 1]} : vector<8x32xf32> to vector<8x16xf32>
    %23 = vector.extract_strided_slice %5 {offsets = [0, 16], sizes = [8, 16], strides = [1, 1]} : vector<8x32xf32> to vector<8x16xf32>
    %24 = vector.extract_strided_slice %6 {offsets = [0, 16], sizes = [8, 16], strides = [1, 1]} : vector<8x32xf32> to vector<8x16xf32>
    %cst_9 = arith.constant dense<0.000000e+00> : vector<8x8xf32>
    %25 = tpu.matmul %22, %23, %cst_9 {dimension_numbers = #tpu.dot_dimension_numbers<[1], [1], [0], [0], [0, 0, 1, 0], [], []>} : vector<8x16xf32>, vector<8x16xf32>, vector<8x8xf32> -> vector<8x8xf32>
    %cst_10 = arith.constant dense<0xFF800000> : vector<8xf32>
    %26 = vector.multi_reduction <maximumf>, %25, %cst_10 [1] : vector<8x8xf32> to vector<8xf32>
    %27 = vector.shape_cast %26 : vector<8xf32> to vector<8x1xf32>
    %28 = vector.broadcast %27 : vector<8x1xf32> to vector<8x8xf32>
    %29 = arith.subf %25, %28 : vector<8x8xf32>
    %30 = math.exp %29 : vector<8x8xf32>
    %cst_11 = arith.constant dense<0.000000e+00> : vector<8xf32>
    %31 = vector.multi_reduction <add>, %30, %cst_11 [1] : vector<8x8xf32> to vector<8xf32>
    %32 = vector.shape_cast %31 : vector<8xf32> to vector<8x1xf32>
    %33 = tpu.reciprocal %32 : vector<8x1xf32> -> vector<8x1xf32>
    %34 = vector.broadcast %33 : vector<8x1xf32> to vector<8x8xf32>
    %35 = arith.mulf %30, %34 : vector<8x8xf32>
    %cst_12 = arith.constant dense<0.000000e+00> : vector<8x16xf32>
    %36 = tpu.matmul %35, %24, %cst_12 {dimension_numbers = #tpu.dot_dimension_numbers<[1], [0], [0], [1], [0, 0, 1, 1], [], []>} : vector<8x8xf32>, vector<8x16xf32>, vector<8x16xf32> -> vector<8x16xf32>
    %37 = tpu.concatenate %21, %36 in 1 : vector<8x16xf32>, vector<8x16xf32> -> vector<8x32xf32>
    %cst_13 = arith.constant dense<0.000000e+00> : vector<8x32xf32>
    %38 = tpu.matmul %37, %2, %cst_13 {dimension_numbers = #tpu.dot_dimension_numbers<[1], [0], [0], [1], [0, 0, 1, 1], [], []>} : vector<8x32xf32>, vector<32x32xf32>, vector<8x32xf32> -> vector<8x32xf32>
    %c0_14 = arith.constant 0 : index
    %c0_15 = arith.constant 0 : index
    %39 = vector.load %arg6[%c0_14, %c0_15] : memref<8x8xf32, #tpu.memory_space<vmem>>, vector<8x8xf32>
    tpu.vector_store %arg6[%c0_14, %c0_15], %35 {strides = array<i32>} : memref<8x8xf32, #tpu.memory_space<vmem>>, vector<8x8xf32>,
    %40 = vector.extract_strided_slice %0 {offsets = [0, 0], sizes = [4, 32], strides = [1, 1]} : vector<8x32xf32> to vector<4x32xf32>
    %c0_16 = arith.constant 0 : index
    %c0_17 = arith.constant 0 : index
    %c0_18 = arith.constant 0 : index
    %41 = vector.load %arg3[%c0_16, %c0_17, %c0_18] : memref<2x32x48xf32, #tpu.memory_space<vmem>>, vector<1x32x48xf32>
    %42 = vector.shape_cast %41 : vector<1x32x48xf32> to vector<32x48xf32>
    %c0_19 = arith.constant 0 : index
    %c0_20 = arith.constant 0 : index
    %c0_21 = arith.constant 0 : index
    %43 = vector.load %arg4[%c0_19, %c0_20, %c0_21] : memref<2x16x32xf32, #tpu.memory_space<vmem>>, vector<1x16x32xf32>
    %44 = vector.shape_cast %43 : vector<1x16x32xf32> to vector<16x32xf32>
    %cst_22 = arith.constant dense<0.000000e+00> : vector<4x48xf32>
    %45 = tpu.matmul %40, %42, %cst_22 {dimension_numbers = #tpu.dot_dimension_numbers<[1], [0], [0], [1], [0, 0, 1, 1], [], []>} : vector<4x32xf32>, vector<32x48xf32>, vector<4x48xf32> -> vector<4x48xf32>
    %46 = vector.extract_strided_slice %45 {offsets = [0, 0], sizes = [4, 16], strides = [1, 1]} : vector<4x48xf32> to vector<4x16xf32>
    %47 = vector.extract_strided_slice %45 {offsets = [0, 16], sizes = [4, 16], strides = [1, 1]} : vector<4x48xf32> to vector<4x16xf32>
    %48 = vector.extract_strided_slice %45 {offsets = [0, 32], sizes = [4, 16], strides = [1, 1]} : vector<4x48xf32> to vector<4x16xf32>
    %49 = vector.extract_strided_slice %46 {offsets = [0, 0], sizes = [4, 8], strides = [1, 1]} : vector<4x16xf32> to vector<4x8xf32>
    %50 = vector.extract_strided_slice %47 {offsets = [0, 0], sizes = [4, 8], strides = [1, 1]} : vector<4x16xf32> to vector<4x8xf32>
    %51 = vector.extract_strided_slice %48 {offsets = [0, 0], sizes = [4, 8], strides = [1, 1]} : vector<4x16xf32> to vector<4x8xf32>
    %cst_23 = arith.constant dense<0.000000e+00> : vector<4x4xf32>
    %52 = tpu.matmul %49, %50, %cst_23 {dimension_numbers = #tpu.dot_dimension_numbers<[1], [1], [0], [0], [0, 0, 1, 0], [], []>} : vector<4x8xf32>, vector<4x8xf32>, vector<4x4xf32> -> vector<4x4xf32>
    %cst_24 = arith.constant dense<0xFF800000> : vector<4xf32>
    %53 = vector.multi_reduction <maximumf>, %52, %cst_24 [1] : vector<4x4xf32> to vector<4xf32>
    %54 = vector.shape_cast %53 : vector<4xf32> to vector<4x1xf32>
    %55 = vector.broadcast %54 : vector<4x1xf32> to vector<4x4xf32>
    %56 = arith.subf %52, %55 : vector<4x4xf32>
    %57 = math.exp %56 : vector<4x4xf32>
    %cst_25 = arith.constant dense<0.000000e+00> : vector<4xf32>
    %58 = vector.multi_reduction <add>, %57, %cst_25 [1] : vector<4x4xf32> to vector<4xf32>
    %59 = vector.shape_cast %58 : vector<4xf32> to vector<4x1xf32>
    %60 = tpu.reciprocal %59 : vector<4x1xf32> -> vector<4x1xf32>
    %61 = vector.broadcast %60 : vector<4x1xf32> to vector<4x4xf32>
    %62 = arith.mulf %57, %61 : vector<4x4xf32>
    %cst_26 = arith.constant dense<0.000000e+00> : vector<4x8xf32>
    %63 = tpu.matmul %62, %51, %cst_26 {dimension_numbers = #tpu.dot_dimension_numbers<[1], [0], [0], [1], [0, 0, 1, 1], [], []>} : vector<4x4xf32>, vector<4x8xf32>, vector<4x8xf32> -> vector<4x8xf32>
    %64 = vector.extract_strided_slice %46 {offsets = [0, 8], sizes = [4, 8], strides = [1, 1]} : vector<4x16xf32> to vector<4x8xf32>
    %65 = vector.extract_strided_slice %47 {offsets = [0, 8], sizes = [4, 8], strides = [1, 1]} : vector<4x16xf32> to vector<4x8xf32>
    %66 = vector.extract_strided_slice %48 {offsets = [0, 8], sizes = [4, 8], strides = [1, 1]} : vector<4x16xf32> to vector<4x8xf32>
    %cst_27 = arith.constant dense<0.000000e+00> : vector<4x4xf32>
    %67 = tpu.matmul %64, %65, %cst_27 {dimension_numbers = #tpu.dot_dimension_numbers<[1], [1], [0], [0], [0, 0, 1, 0], [], []>} : vector<4x8xf32>, vector<4x8xf32>, vector<4x4xf32> -> vector<4x4xf32>
    %cst_28 = arith.constant dense<0xFF800000> : vector<4xf32>
    %68 = vector.multi_reduction <maximumf>, %67, %cst_28 [1] : vector<4x4xf32> to vector<4xf32>
    %69 = vector.shape_cast %68 : vector<4xf32> to vector<4x1xf32>
    %70 = vector.broadcast %69 : vector<4x1xf32> to vector<4x4xf32>
    %71 = arith.subf %67, %70 : vector<4x4xf32>
    %72 = math.exp %71 : vector<4x4xf32>
    %cst_29 = arith.constant dense<0.000000e+00> : vector<4xf32>
    %73 = vector.multi_reduction <add>, %72, %cst_29 [1] : vector<4x4xf32> to vector<4xf32>
    %74 = vector.shape_cast %73 : vector<4xf32> to vector<4x1xf32>
    %75 = tpu.reciprocal %74 : vector<4x1xf32> -> vector<4x1xf32>
    %76 = vector.broadcast %75 : vector<4x1xf32> to vector<4x4xf32>
    %77 = arith.mulf %72, %76 : vector<4x4xf32>
    %cst_30 = arith.constant dense<0.000000e+00> : vector<4x8xf32>
    %78 = tpu.matmul %77, %66, %cst_30 {dimension_numbers = #tpu.dot_dimension_numbers<[1], [0], [0], [1], [0, 0, 1, 1], [], []>} : vector<4x4xf32>, vector<4x8xf32>, vector<4x8xf32> -> vector<4x8xf32>
    %79 = tpu.concatenate %63, %78 in 1 : vector<4x8xf32>, vector<4x8xf32> -> vector<4x16xf32>
    %cst_31 = arith.constant dense<0.000000e+00> : vector<4x32xf32>
    %80 = tpu.matmul %79, %44, %cst_31 {dimension_numbers = #tpu.dot_dimension_numbers<[1], [0], [0], [1], [0, 0, 1, 1], [], []>} : vector<4x16xf32>, vector<16x32xf32>, vector<4x32xf32> -> vector<4x32xf32>
    %81 = vector.extract_strided_slice %38 {offsets = [0, 0], sizes = [4, 32], strides = [1, 1]} : vector<8x32xf32> to vector<4x32xf32>
    %82 = arith.mulf %81, %81 : vector<4x32xf32>
    %cst_32 = arith.constant dense<0.000000e+00> : vector<4xf32>
    %83 = vector.multi_reduction <add>, %82, %cst_32 [1] : vector<4x32xf32> to vector<4xf32>
    %84 = vector.shape_cast %83 : vector<4xf32> to vector<4x1xf32>
    %cst_33 = arith.constant 1.000000e-24 : f32
    %85 = vector.broadcast %cst_33 : f32 to vector<4x1xf32>
    %86 = arith.maximumf %84, %85 : vector<4x1xf32>
    %87 = math.rsqrt %86 : vector<4x1xf32>
    %88 = vector.broadcast %87 : vector<4x1xf32> to vector<4x32xf32>
    %89 = arith.mulf %81, %88 : vector<4x32xf32>
    %90 = arith.mulf %80, %80 : vector<4x32xf32>
    %cst_34 = arith.constant dense<0.000000e+00> : vector<4xf32>
    %91 = vector.multi_reduction <add>, %90, %cst_34 [1] : vector<4x32xf32> to vector<4xf32>
    %92 = vector.shape_cast %91 : vector<4xf32> to vector<4x1xf32>
    %cst_35 = arith.constant 1.000000e-24 : f32
    %93 = vector.broadcast %cst_35 : f32 to vector<4x1xf32>
    %94 = arith.maximumf %92, %93 : vector<4x1xf32>
    %95 = math.rsqrt %94 : vector<4x1xf32>
    %96 = vector.broadcast %95 : vector<4x1xf32> to vector<4x32xf32>
    %97 = arith.mulf %80, %96 : vector<4x32xf32>
    %98 = arith.addf %89, %97 : vector<4x32xf32>
    %99 = vector.extract_strided_slice %0 {offsets = [4, 0], sizes = [4, 32], strides = [1, 1]} : vector<8x32xf32> to vector<4x32xf32>
    %c1 = arith.constant 1 : index
    %c0_36 = arith.constant 0 : index
    %c0_37 = arith.constant 0 : index
    %100 = vector.load %arg3[%c1, %c0_36, %c0_37] : memref<2x32x48xf32, #tpu.memory_space<vmem>>, vector<1x32x48xf32>
    %101 = vector.shape_cast %100 : vector<1x32x48xf32> to vector<32x48xf32>
    %c1_38 = arith.constant 1 : index
    %c0_39 = arith.constant 0 : index
    %c0_40 = arith.constant 0 : index
    %102 = vector.load %arg4[%c1_38, %c0_39, %c0_40] : memref<2x16x32xf32, #tpu.memory_space<vmem>>, vector<1x16x32xf32>
    %103 = vector.shape_cast %102 : vector<1x16x32xf32> to vector<16x32xf32>
    %cst_41 = arith.constant dense<0.000000e+00> : vector<4x48xf32>
    %104 = tpu.matmul %99, %101, %cst_41 {dimension_numbers = #tpu.dot_dimension_numbers<[1], [0], [0], [1], [0, 0, 1, 1], [], []>} : vector<4x32xf32>, vector<32x48xf32>, vector<4x48xf32> -> vector<4x48xf32>
    %105 = vector.extract_strided_slice %104 {offsets = [0, 0], sizes = [4, 16], strides = [1, 1]} : vector<4x48xf32> to vector<4x16xf32>
    %106 = vector.extract_strided_slice %104 {offsets = [0, 16], sizes = [4, 16], strides = [1, 1]} : vector<4x48xf32> to vector<4x16xf32>
    %107 = vector.extract_strided_slice %104 {offsets = [0, 32], sizes = [4, 16], strides = [1, 1]} : vector<4x48xf32> to vector<4x16xf32>
    %108 = vector.extract_strided_slice %105 {offsets = [0, 0], sizes = [4, 8], strides = [1, 1]} : vector<4x16xf32> to vector<4x8xf32>
    %109 = vector.extract_strided_slice %106 {offsets = [0, 0], sizes = [4, 8], strides = [1, 1]} : vector<4x16xf32> to vector<4x8xf32>
    %110 = vector.extract_strided_slice %107 {offsets = [0, 0], sizes = [4, 8], strides = [1, 1]} : vector<4x16xf32> to vector<4x8xf32>
    %cst_42 = arith.constant dense<0.000000e+00> : vector<4x4xf32>
    %111 = tpu.matmul %108, %109, %cst_42 {dimension_numbers = #tpu.dot_dimension_numbers<[1], [1], [0], [0], [0, 0, 1, 0], [], []>} : vector<4x8xf32>, vector<4x8xf32>, vector<4x4xf32> -> vector<4x4xf32>
    %cst_43 = arith.constant dense<0xFF800000> : vector<4xf32>
    %112 = vector.multi_reduction <maximumf>, %111, %cst_43 [1] : vector<4x4xf32> to vector<4xf32>
    %113 = vector.shape_cast %112 : vector<4xf32> to vector<4x1xf32>
    %114 = vector.broadcast %113 : vector<4x1xf32> to vector<4x4xf32>
    %115 = arith.subf %111, %114 : vector<4x4xf32>
    %116 = math.exp %115 : vector<4x4xf32>
    %cst_44 = arith.constant dense<0.000000e+00> : vector<4xf32>
    %117 = vector.multi_reduction <add>, %116, %cst_44 [1] : vector<4x4xf32> to vector<4xf32>
    %118 = vector.shape_cast %117 : vector<4xf32> to vector<4x1xf32>
    %119 = tpu.reciprocal %118 : vector<4x1xf32> -> vector<4x1xf32>
    %120 = vector.broadcast %119 : vector<4x1xf32> to vector<4x4xf32>
    %121 = arith.mulf %116, %120 : vector<4x4xf32>
    %cst_45 = arith.constant dense<0.000000e+00> : vector<4x8xf32>
    %122 = tpu.matmul %121, %110, %cst_45 {dimension_numbers = #tpu.dot_dimension_numbers<[1], [0], [0], [1], [0, 0, 1, 1], [], []>} : vector<4x4xf32>, vector<4x8xf32>, vector<4x8xf32> -> vector<4x8xf32>
    %123 = vector.extract_strided_slice %105 {offsets = [0, 8], sizes = [4, 8], strides = [1, 1]} : vector<4x16xf32> to vector<4x8xf32>
    %124 = vector.extract_strided_slice %106 {offsets = [0, 8], sizes = [4, 8], strides = [1, 1]} : vector<4x16xf32> to vector<4x8xf32>
    %125 = vector.extract_strided_slice %107 {offsets = [0, 8], sizes = [4, 8], strides = [1, 1]} : vector<4x16xf32> to vector<4x8xf32>
    %cst_46 = arith.constant dense<0.000000e+00> : vector<4x4xf32>
    %126 = tpu.matmul %123, %124, %cst_46 {dimension_numbers = #tpu.dot_dimension_numbers<[1], [1], [0], [0], [0, 0, 1, 0], [], []>} : vector<4x8xf32>, vector<4x8xf32>, vector<4x4xf32> -> vector<4x4xf32>
    %cst_47 = arith.constant dense<0xFF800000> : vector<4xf32>
    %127 = vector.multi_reduction <maximumf>, %126, %cst_47 [1] : vector<4x4xf32> to vector<4xf32>
    %128 = vector.shape_cast %127 : vector<4xf32> to vector<4x1xf32>
    %129 = vector.broadcast %128 : vector<4x1xf32> to vector<4x4xf32>
    %130 = arith.subf %126, %129 : vector<4x4xf32>
    %131 = math.exp %130 : vector<4x4xf32>
    %cst_48 = arith.constant dense<0.000000e+00> : vector<4xf32>
    %132 = vector.multi_reduction <add>, %131, %cst_48 [1] : vector<4x4xf32> to vector<4xf32>
    %133 = vector.shape_cast %132 : vector<4xf32> to vector<4x1xf32>
    %134 = tpu.reciprocal %133 : vector<4x1xf32> -> vector<4x1xf32>
    %135 = vector.broadcast %134 : vector<4x1xf32> to vector<4x4xf32>
    %136 = arith.mulf %131, %135 : vector<4x4xf32>
    %cst_49 = arith.constant dense<0.000000e+00> : vector<4x8xf32>
    %137 = tpu.matmul %136, %125, %cst_49 {dimension_numbers = #tpu.dot_dimension_numbers<[1], [0], [0], [1], [0, 0, 1, 1], [], []>} : vector<4x4xf32>, vector<4x8xf32>, vector<4x8xf32> -> vector<4x8xf32>
    %138 = tpu.concatenate %122, %137 in 1 : vector<4x8xf32>, vector<4x8xf32> -> vector<4x16xf32>
    %cst_50 = arith.constant dense<0.000000e+00> : vector<4x32xf32>
    %139 = tpu.matmul %138, %103, %cst_50 {dimension_numbers = #tpu.dot_dimension_numbers<[1], [0], [0], [1], [0, 0, 1, 1], [], []>} : vector<4x16xf32>, vector<16x32xf32>, vector<4x32xf32> -> vector<4x32xf32>
    %140 = vector.extract_strided_slice %38 {offsets = [4, 0], sizes = [4, 32], strides = [1, 1]} : vector<8x32xf32> to vector<4x32xf32>
    %141 = arith.mulf %140, %140 : vector<4x32xf32>
    %cst_51 = arith.constant dense<0.000000e+00> : vector<4xf32>
    %142 = vector.multi_reduction <add>, %141, %cst_51 [1] : vector<4x32xf32> to vector<4xf32>
    %143 = vector.shape_cast %142 : vector<4xf32> to vector<4x1xf32>
    %cst_52 = arith.constant 1.000000e-24 : f32
    %144 = vector.broadcast %cst_52 : f32 to vector<4x1xf32>
    %145 = arith.maximumf %143, %144 : vector<4x1xf32>
    %146 = math.rsqrt %145 : vector<4x1xf32>
    %147 = vector.broadcast %146 : vector<4x1xf32> to vector<4x32xf32>
    %148 = arith.mulf %140, %147 : vector<4x32xf32>
    %149 = arith.mulf %139, %139 : vector<4x32xf32>
    %cst_53 = arith.constant dense<0.000000e+00> : vector<4xf32>
    %150 = vector.multi_reduction <add>, %149, %cst_53 [1] : vector<4x32xf32> to vector<4xf32>
    %151 = vector.shape_cast %150 : vector<4xf32> to vector<4x1xf32>
    %cst_54 = arith.constant 1.000000e-24 : f32
    %152 = vector.broadcast %cst_54 : f32 to vector<4x1xf32>
    %153 = arith.maximumf %151, %152 : vector<4x1xf32>
    %154 = math.rsqrt %153 : vector<4x1xf32>
    %155 = vector.broadcast %154 : vector<4x1xf32> to vector<4x32xf32>
    %156 = arith.mulf %139, %155 : vector<4x32xf32>
    %157 = arith.addf %148, %156 : vector<4x32xf32>
    %158 = tpu.concatenate %98, %157 in 0 : vector<4x32xf32>, vector<4x32xf32> -> vector<8x32xf32>
    %c0_55 = arith.constant 0 : index
    %c0_56 = arith.constant 0 : index
    %159 = vector.load %arg5[%c0_55, %c0_56] : memref<8x32xf32, #tpu.memory_space<vmem>>, vector<8x32xf32>
    tpu.vector_store %arg5[%c0_55, %c0_56], %158 {strides = array<i32>} : memref<8x32xf32, #tpu.memory_space<vmem>>, vector<8x32xf32>,
    return
  }
}

</mosaic_0001>

<bundles_post_ra>
// kernel: tpu_custom_call.1
= control target key start
LH: loop header
LB: loop body
LE: loop exit
PB: predicated region body
PF: predicated region fallthrough
CT: control target
= control target key end

     0   :  { %12 = vsyncpa [#allocation3], 0  ;;  %s2261_s0 = inlined_call_operand.hbm [shape: f32[8,32], index: 0, kind: input, shape index: {}]   ;;  %s2262_s1 = inlined_call_operand.hbm [shape: f32[32,96], index: 1, kind: input, shape index: {}]   ;;  %s2263_s2 = inlined_call_operand.hbm [shape: f32[32,32], index: 2, kind: input, shape index: {}]   ;;  %s2264_s3 = inlined_call_operand.hbm [shape: f32[2,32,48], index: 3, kind: input, shape index: {}]   ;;  %s2265_s4 = inlined_call_operand.hbm [shape: f32[2,16,32], index: 4, kind: input, shape index: {}]   ;;  %s2266_s5 = inlined_call_operand.hbm [shape: f32[8,32], index: 5, kind: output, shape index: {0}]   ;;  %s2267_s6 = inlined_call_operand.hbm [shape: f32[8,8], index: 6, kind: output, shape index: {1}]  }
   0x1   :  { %13 = vsyncpa [#allocation6], 0 }
   0x2   :  { %14 = vsyncpa [#allocation9], 0 }
   0x3   :  { %15 = vsyncpa [#allocation4], 0 }
   0x4   :  { %16 = vsyncpa [#allocation13], 0  ;;  %s2026_s21 = smov [#allocation5]  }
   0x5   :  { %s32_s22 = sshll.u32 %s2026_s21, 4  ;;  %s33_s22 = int_to_ptr.vmem [resolvable:$true] %s32_s22 }
   0x6   :  { %s1884_s23 = scalar_lea.vmem %s33_s22, 512  ;;  %p1889_p1 = scmp.lt.s32.totalorder %s33_s22, %s33_s22 }
   0x7   :  { %p1885_p0 = scmp.ne.s32.totalorder %s33_s22, %s1884_s23  ;;  %p1890_p2 = scmp.lt.s32.totalorder %s1884_s23, %s1884_s23 }
   0x9   :  { %p1891_p3 = por %p1890_p2, %p1889_p1 }
   0xb   :  { %p1892_p4 = pnand %p1891_p3, %p1885_p0 }
   0xd   :  { %1895 = shalt.err (!%p1892_p4)
}
   0xe   :  { %s2027_s24 = smov 128   ;;  %s2028_s25 = smov 8  }
   0xf   :  { %38 = dma.hbm_to_vmem [thread:$0]  %s2262_s1, 512, %s33_s22, [#allocation6], %s2027_s24, %s2027_s24, %s2028_s25  }
  0x10   :  { %s2029_s28 = smov [#allocation8]   ;;  %s2030_s30 = smov [#allocation2]  }
  0x11   :  { %s56_s29 = sshll.u32 %s2029_s28, 4  ;;  %s23_s7 = sshll.u32 %s2030_s30, 4  ;;  %s57_s29 = int_to_ptr.vmem [resolvable:$true] %s56_s29  ;;  %s24_s7 = int_to_ptr.vmem [resolvable:$true] %s23_s7 }
  0x12   :  { %s1904_s8 = scalar_lea.vmem %s57_s29, 1024  ;;  %p1909_p6 = scmp.lt.s32.totalorder %s57_s29, %s57_s29 }
  0x13   :  { %p1905_p5 = scmp.ne.s32.totalorder %s57_s29, %s1904_s8  ;;  %p1910_p7 = scmp.lt.s32.totalorder %s1904_s8, %s1904_s8 }
  0x15   :  { %p1911_p8 = por %p1910_p7, %p1909_p6 }
  0x17   :  { %p1912_p9 = pnand %p1911_p8, %p1905_p5 }
  0x19   :  { %1915 = shalt.err (!%p1912_p9)
}
  0x1a   :  { %62 = dma.hbm_to_vmem [thread:$0]  %s2264_s3, 1024, %s57_s29, [#allocation9], %s2027_s24, %s2027_s24, %s2028_s25  }
  0x1b   :  { %s1924_s1 = scalar_lea.vmem %s24_s7, 128  ;;  %p1929_p11 = scmp.lt.s32.totalorder %s24_s7, %s24_s7 }
  0x1c   :  { %p1925_p10 = scmp.ne.s32.totalorder %s24_s7, %s1924_s1  ;;  %p1930_p12 = scmp.lt.s32.totalorder %s1924_s1, %s1924_s1 }
  0x1e   :  { %p1931_p13 = por %p1930_p12, %p1929_p11 }
  0x20   :  { %p1932_p0 = pnand %p1931_p13, %p1925_p10 }
  0x22   :  { %1935 = shalt.err (!%p1932_p0)
}
  0x23   :  { %26 = dma.hbm_to_vmem [thread:$0]  %s2261_s0, 128, %s24_s7, [#allocation3]  }
  0x24   :  { %s2031_s13 = smov [#allocation7]   ;;  %s2032_s15 = smov [#allocation10]  }
  0x25   :  { %s44_s14 = sshll.u32 %s2031_s13, 4  ;;  %s68_s16 = sshll.u32 %s2032_s15, 4  ;;  %s45_s14 = int_to_ptr.vmem [resolvable:$true] %s44_s14  ;;  %s69_s16 = int_to_ptr.vmem [resolvable:$true] %s68_s16 }
  0x26   :  { %s1944_s17 = scalar_lea.vmem %s45_s14, 512  ;;  %p1949_p2 = scmp.lt.s32.totalorder %s45_s14, %s45_s14 }
  0x27   :  { %p1945_p1 = scmp.ne.s32.totalorder %s45_s14, %s1944_s17  ;;  %p1950_p3 = scmp.lt.s32.totalorder %s1944_s17, %s1944_s17 }
  0x29   :  { %p1951_p4 = por %p1950_p3, %p1949_p2 }
  0x2b   :  { %p1952_p5 = pnand %p1951_p4, %p1945_p1 }
  0x2d   :  { %1955 = shalt.err (!%p1952_p5)
}
  0x2e   :  { %50 = dma.hbm_to_vmem [thread:$0]  %s2263_s2, 512, %s45_s14, [#allocation6], %s2027_s24, %s2027_s24, %s2028_s25  }
  0x2f   :  { %s1964_s0 = scalar_lea.vmem %s69_s16, 512  ;;  %p1969_p7 = scmp.lt.s32.totalorder %s69_s16, %s69_s16 }
  0x30   :  { %p1965_p6 = scmp.ne.s32.totalorder %s69_s16, %s1964_s0  ;;  %p1970_p8 = scmp.lt.s32.totalorder %s1964_s0, %s1964_s0 }
  0x32   :  { %p1971_p9 = por %p1970_p8, %p1969_p7 }
  0x34   :  { %p1972_p10 = pnand %p1971_p9, %p1965_p6 }
  0x36   :  { %1975 = shalt.err (!%p1972_p10)
}
  0x37   :  { %74 = dma.hbm_to_vmem [thread:$0]  %s2265_s4, 512, %s69_s16, [#allocation9], %s2027_s24, %s2027_s24, %s2028_s25  }
  0x38   :  { %2016 = dma.done.wait [#allocation3], 128  }
  0x39   :  { %2017 = vsyncadd [#allocation3], 4294967168 }
  0x3a   :  { %2018 = dma.done.wait [#allocation6], 1024  }
  0x3b   :  { %2019 = vsyncadd [#allocation6], 4294966272 }
  0x3c   :  { %2020 = dma.done.wait [#allocation9], 1536  }
  0x3d   :  { %2021 = vsyncadd [#allocation9], 4294965760  ;;  %v2033_v0 = vmov 0.0   ;;  %vm2034_vm0 = vmmov 0   ;;  %v94_v1 = vld [vmem:[#allocation5 + $0x18] sm:$0xff]  ;;  %v93_v2 = vld [vmem:[#allocation5 + $0x10] sm:$0xff] }
  0x3e   :  { %1706 = vmatprep.subr.mxu0 %v2033_v0  ;;  %1714 = vmatprep.mubr.msk.f32.mxu0 %vm2034_vm0, %v2033_v0  ;;  %v92_v3 = vld [vmem:[#allocation5 + $0x8] sm:$0xff]  ;;  %v91_v4 = vld [vmem:[#allocation5] sm:$0xff]  ;;  %v2116_v5 = vld [vmem:[#allocation2] sm:$0xff]  ;;  %vm99_vm1 = vcmask 261120   ;;  %s2035_s2 = smov 112   ;;  %s2036_s4 = smov 96  }
  0x3f   :  { %1717 = vmatprep.subr.mxu1 %v2033_v0  ;;  %1719 = vmatprep.mubr.msk.f32.mxu1 %vm2034_vm0, %v2033_v0  ;;  %s2037_s21 = smov 80   ;;  %vm176_vm2 = vcmask 130048   ;;  %vm251_vm3 = vcmask 64512   ;;  %s2038_s22 = smov 48   ;;  %v586_v35 = vld [vmem:[#allocation8 + $0x18] sm:$0xff]  ;;  %v585_v36 = vld [vmem:[#allocation8 + $0x10] sm:$0xff] }
  0x40   :  { %1707 = vmatpush3.msra.mxu0 %v94_v1  ;;  %s2039_s23 = smov 64   ;;  %v584_v37 = vld [vmem:[#allocation8 + $0x8] sm:$0xff]  ;;  %v583_v38 = vld [vmem:[#allocation8] sm:$0xff]  ;;  %v98_v39 = vld [vmem:[#allocation7 + $0x18] sm:$0xff]  ;;  %s2040_s24 = smov 16   ;;  %vm736_vm4 = vcmask 27648  }
  0x41   :  { %1708 = vmatprep.subr.mxu0 %v2033_v0  ;;  %v97_v40 = vld [vmem:[#allocation7 + $0x10] sm:$0xff]  ;;  %v96_v41 = vld [vmem:[#allocation7 + $0x8] sm:$0xff]  ;;  %v95_v42 = vld [vmem:[#allocation7] sm:$0xff]  ;;  %s2041_s26 = smov 104   ;;  %s2042_s27 = smov 120   ;;  %vm754_vm5 = vcmask 1043456  }
  0x42   :  { %1709 = vmatpush3.msra.mxu0 %v93_v2  ;;  %s2043_s28 = smov 88   ;;  %vm750_vm6 = vcmask 31744   ;;  %vm1072_vm7 = vcmask 257024   ;;  %vm1577_vm8 = vcmask 261124   ;;  %s2044_s29 = smov [#allocation12]  }
  0x43   :  { %1710 = vmatprep.subr.mxu0 %v2033_v0 }
  0x44   :  { %1711 = vmatpush3.msra.mxu0 %v92_v3 }
  0x45   :  { %1712 = vmatprep.subr.mxu0 %v2033_v0 }
  0x46   :  { %1713 = vmatpush3.msra.mxu0 %v91_v4 }
  0x47   :  { %1715 = vmatmul.mubr.msk.f32.vlgmr.msra.gmra.mxu0 %vm99_vm1, %v2116_v5  ;;  %1727 = vmatprep.subr.mxu0 %v2033_v0 }
  0x48   :  { %1729 = vmatprep.mubr.msk.f32.mxu0 %vm2034_vm0, %v2033_v0 }
 0x107   :  { %v169_v6 = vpop.f32.mrf.mxu0 }
 0x108   :  { %339 = vrot.lane.b32.xlu1 %v169_v6, %s2035_s2  ;;  %174 = vrot.lane.b32.xlu0 %v169_v6, %s2036_s4 }
 0x109   :  { %v1716_v7 = vpop.f32.mrf.mxu0 }
 0x10c   :  { %341 = vrot.lane.b32.xlu0 %v169_v6, %s2037_s21 }
 0x17a   :  { %v175_v8 = vpop.permute.xlu0 %174  ;;  %v340_v10 = vpop.permute.xlu1 %339 }
 0x17b   :  { %1718 = vmatpush3.xpose.msk.msra.mxu1 %vm176_vm2, %v175_v8 }
 0x17c   :  { %1722 = vmatprep.subr.mxu1 %v2033_v0 }
 0x17e   :  { %1720 = vmatmul.mubr.msk.f32.vlgmr.msra.gmra.mxu1 %vm176_vm2, %v169_v6  ;;  %v342_v9 = vpop.permute.xlu0 %341 }
 0x17f   :  { %1728 = vmatpush3.xpose.msk.msra.mxu0 %vm176_vm2, %v342_v9  ;;  %1724 = vmatprep.mubr.msk.f32.mxu1 %vm2034_vm0, %v2033_v0 }
 0x180   :  { %1737 = vmatprep.subr.mxu0 %v2033_v0 }
 0x182   :  { %1730 = vmatmul.mubr.msk.f32.vlgmr.msra.gmra.mxu0 %vm176_vm2, %v340_v10 }
 0x183   :  { %1745 = vmatprep.mubr.msk.f32.mxu0 %vm2034_vm0, %v2033_v0  ;;  %1738 = vmatpush3.msra.mxu0 %v98_v39 }
 0x184   :  { %1739 = vmatprep.subr.mxu0 %v2033_v0 }
 0x185   :  { %1740 = vmatpush3.msra.mxu0 %v97_v40 }
 0x186   :  { %1741 = vmatprep.subr.mxu0 %v2033_v0 }
 0x187   :  { %1742 = vmatpush3.msra.mxu0 %v96_v41 }
 0x188   :  { %1743 = vmatprep.subr.mxu0 %v2033_v0 }
 0x189   :  { %1744 = vmatpush3.msra.mxu0 %v95_v42 }
 0x18a   :  { %1759 = vmatprep.subr.mxu0 %v2033_v0 }
 0x23e   :  { %v247_v11 = vpop.f32.mrf.mxu1 }
 0x23f   :  { %v252_v12 = vsel %vm251_vm3, %v247_v11, -inf }
 0x240   :  { %253 = vmax.xlane.f32.xlu1 %v252_v12  ;;  %v1721_v13 = vpop.f32.mrf.mxu1 }
 0x242   :  { %v413_v14 = vpop.f32.mrf.mxu0 }
 0x243   :  { %v417_v15 = vsel %vm251_vm3, %v413_v14, -inf }
 0x244   :  { %418 = vmax.xlane.f32.xlu0 %v417_v15  ;;  %v1731_v16 = vpop.f32.mrf.mxu0 }
 0x2c9   :  { %v254_v17 = vpop.xlane.xlu1 %253 }
 0x2ca   :  { %v255_v18 = vsub.f32 %v247_v11, %v254_v17 }
 0x2cc   :  { %v256_v19 = vmul.f32 1.442695, %v255_v18  ;;  %v1091_v18 = vld [vmem:[#allocation8 + $0x38] sm:$0xff] }
 0x2cd   :  { %v419_v20 = vpop.xlane.xlu0 %418 }
 0x2ce   :  { %1844 = vpow2.f32 %v256_v19  ;;  %v420_v21 = vsub.f32 %v413_v14, %v419_v20  ;;  %v1090_v19 = vld [vmem:[#allocation8 + $0x30] sm:$0xff]  ;;  %v1089_v20 = vld [vmem:[#allocation8 + $0x28] sm:$0xff] }
 0x2d0   :  { %v421_v22 = vmul.f32 1.442695, %v420_v21  ;;  %v1095_v21 = vrot.slane %v2116_v5, 4 }
 0x2d2   :  { %1846 = vpow2.f32 %v421_v22  ;;  %v1088_v22 = vld [vmem:[#allocation8 + $0x20] sm:$0xff] }
 0x2db   :  { %v1845_v23 = vpop.eup %1844 }
 0x2dc   :  { %v258_v24 = vsel %vm251_vm3, %v1845_v23, 0.0 }
 0x2dd   :  { %259 = vadd.xlane.f32.xlu0 %v258_v24  ;;  %v587_v24 = vld [vmem:[#allocation10] sm:$0xff] }
 0x2df   :  { %v1847_v25 = vpop.eup %1846 }
 0x2e0   :  { %v423_v26 = vsel %vm251_vm3, %v1847_v25, 0.0 }
 0x2e1   :  { %424 = vadd.xlane.f32.xlu1 %v423_v26 }
 0x2f2   :  { %428 = vrot.lane.b32.xlu1 %v169_v6, %s2038_s22 }
 0x2f3   :  { %263 = vrot.lane.b32.xlu0 %v169_v6, %s2039_s23 }
 0x366   :  { %v260_v27 = vpop.xlane.xlu0 %259 }
 0x367   :  { %1848 = vrcp.f32 %v260_v27 }
 0x36a   :  { %v425_v28 = vpop.xlane.xlu1 %424  ;;  %v264_v29 = vpop.permute.xlu0 %263 }
 0x36b   :  { %1850 = vrcp.f32 %v425_v28  ;;  %1723 = vmatpush3.msra.mxu1 %v264_v29 }
 0x36c   :  { %1732 = vmatprep.subr.mxu1 %v2033_v0 }
 0x36e   :  { %v429_v32 = vpop.permute.xlu1 %428 }
 0x374   :  { %v1849_v30 = vpop.eup %1848 }
 0x375   :  { %v262_v31 = vmul.f32 %v1849_v30, %v1845_v23  ;;  %v588_v23 = vld [vmem:[#allocation10 + $0x8] sm:$0xff] }
 0x377   :  { %1725 = vmatmul.mubr.msk.f32.vlgmr.msra.gmra.mxu1 %vm251_vm3, %v262_v31 }
 0x378   :  { %v1851_v33 = vpop.eup %1850  ;;  %1733 = vmatpush3.msra.mxu1 %v429_v32  ;;  %1734 = vmatprep.mubr.msk.f32.mxu1 %vm2034_vm0, %v2033_v0 }
 0x379   :  { %1748 = vmatprep.subr.mxu1 %v2033_v0  ;;  %v427_v34 = vmul.f32 %v1851_v33, %v1847_v25 }
 0x37b   :  { %1735 = vmatmul.mubr.msk.f32.vlgmr.msra.gmra.mxu1 %vm251_vm3, %v427_v34  ;;  %582 = vst.msk [vmem:[#allocation12] sm:$0xff] %vm251_vm3, %v427_v34 }
 0x37c   :  { %1749 = vmatpush3.msra.mxu1 %v586_v35  ;;  %1756 = vmatprep.mubr.msk.f32.mxu1 %vm2034_vm0, %v2033_v0 }
 0x37d   :  { %1750 = vmatprep.subr.mxu1 %v2033_v0 }
 0x37e   :  { %1751 = vmatpush3.msra.mxu1 %v585_v36 }
 0x37f   :  { %1752 = vmatprep.subr.mxu1 %v2033_v0 }
 0x380   :  { %1753 = vmatpush3.msra.mxu1 %v584_v37 }
 0x381   :  { %1754 = vmatprep.subr.mxu1 %v2033_v0 }
 0x382   :  { %1755 = vmatpush3.msra.mxu1 %v583_v38 }
 0x383   :  { %1757 = vmatmul.mubr.msk.f32.vlgmr.msra.gmra.mxu1 %vm99_vm1, %v2116_v5  ;;  %1764 = vmatprep.subr.mxu1 %v2033_v0 }
 0x384   :  { %1766 = vmatprep.mubr.msk.f32.mxu1 %vm2034_vm0, %v2033_v0 }
 0x437   :  { %v335_v43 = vpop.f32.mrf.mxu1 }
 0x439   :  { %v1726_v44 = vpop.f32.mrf.mxu1 }
 0x43b   :  { %v500_v45 = vpop.f32.mrf.mxu1 }
 0x43c   :  { %505 = vrot.lane.b32.xlu1 %v500_v45, %s2040_s24 }
 0x43d   :  { %v1736_v46 = vpop.f32.mrf.mxu1 }
 0x443   :  { %v655_v47 = vpop.f32.mrf.mxu1 }
 0x444   :  { %829 = vrot.lane.b32.xlu1 %v655_v47, %s2041_s26  ;;  %660 = vrot.lane.b32.xlu0 %v655_v47, %s2035_s2 }
 0x445   :  { %v1758_v48 = vpop.f32.mrf.mxu1 }
 0x448   :  { %827 = vrot.lane.b32.xlu0 %v655_v47, %s2042_s27 }
 0x4ae   :  { %v506_v49 = vpop.permute.xlu1 %505 }
 0x4af   :  { %v508_v50 = vsel %vm176_vm2, %v335_v43, %v506_v49 }
 0x4b0   :  { %1746 = vmatmul.mubr.msk.f32.vlgmr.msra.gmra.mxu0 %vm99_vm1, %v508_v50 }
 0x4b1   :  { %1761 = vmatprep.mubr.msk.f32.mxu0 %vm2034_vm0, %v2033_v0 }
 0x4b6   :  { %v661_v51 = vpop.permute.xlu0 %660  ;;  %v830_v52 = vpop.permute.xlu1 %829 }
 0x4b7   :  { %1760 = vmatpush3.xpose.msk.msra.mxu0 %vm251_vm3, %v661_v51 }
 0x4b8   :  { %1769 = vmatprep.subr.mxu0 %v2033_v0 }
 0x4ba   :  { %1762 = vmatmul.mubr.msk.f32.vlgmr.msra.gmra.mxu0 %vm251_vm3, %v655_v47  ;;  %v828_v53 = vpop.permute.xlu0 %827 }
 0x4bb   :  { %1770 = vmatpush3.xpose.msk.msra.mxu0 %vm251_vm3, %v830_v52  ;;  %1771 = vmatprep.mubr.msk.f32.mxu0 %vm2034_vm0, %v2033_v0 }
 0x4bc   :  { %1779 = vmatprep.subr.mxu0 %v2033_v0 }
 0x4be   :  { %1772 = vmatmul.mubr.msk.f32.vlgmr.msra.gmra.mxu0 %vm251_vm3, %v828_v53 }
 0x4bf   :  { %1783 = vmatprep.mubr.msk.f32.mxu0 %vm2034_vm0, %v2033_v0  ;;  %1780 = vmatpush3.msra.mxu0 %v588_v23 }
 0x4c0   :  { %1781 = vmatprep.subr.mxu0 %v2033_v0 }
 0x4c1   :  { %1782 = vmatpush3.msra.mxu0 %v587_v24 }
 0x4c2   :  { %1797 = vmatprep.subr.mxu0 %v2033_v0 }
 0x570   :  { %v2178_v54 = vpop.f32.mrf.mxu0 }
 0x571   :  { %v1071_v53 = vmul.f32 %v2178_v54, %v2178_v54 }
 0x572   :  { %v1747_v55 = vpop.f32.mrf.mxu0 }
 0x573   :  { %v1073_v55 = vsel %vm1072_vm7, %v1071_v53, 0.0 }
 0x57a   :  { %v732_v56 = vpop.f32.mrf.mxu0 }
 0x57b   :  { %v737_v57 = vsel %vm736_vm4, %v732_v56, -inf }
 0x57c   :  { %738 = vmax.xlane.f32.xlu1 %v737_v57  ;;  %v1763_v58 = vpop.f32.mrf.mxu0 }
 0x57e   :  { %v901_v59 = vpop.f32.mrf.mxu0 }
 0x57f   :  { %v905_v60 = vsel %vm736_vm4, %v901_v59, -inf }
 0x580   :  { %906 = vmax.xlane.f32.xlu0 %v905_v60  ;;  %v1773_v61 = vpop.f32.mrf.mxu0 }
 0x605   :  { %v739_v62 = vpop.xlane.xlu1 %738 }
 0x606   :  { %v740_v63 = vsub.f32 %v732_v56, %v739_v62  ;;  %v1578_v56 = vsel %vm1577_vm8, %v1071_v53, 0.0 }
 0x608   :  { %v741_v1 = vmul.f32 1.442695, %v740_v63 }
 0x609   :  { %v907_v2 = vpop.xlane.xlu0 %906 }
 0x60a   :  { %1852 = vpow2.f32 %v741_v1  ;;  %v908_v3 = vsub.f32 %v901_v59, %v907_v2  ;;  %v1094_v2 = vld [vmem:[#allocation10 + $0x18] sm:$0xff] }
 0x60c   :  { %v909_v4 = vmul.f32 1.442695, %v908_v3  ;;  %v1093_v3 = vld [vmem:[#allocation10 + $0x10] sm:$0xff] }
 0x60e   :  { %1854 = vpow2.f32 %v909_v4 }
 0x617   :  { %v1853_v6 = vpop.eup %1852 }
 0x618   :  { %v743_v7 = vsel %vm736_vm4, %v1853_v6, 0.0 }
 0x619   :  { %744 = vadd.xlane.f32.xlu0 %v743_v7 }
 0x61b   :  { %v1855_v8 = vpop.eup %1854 }
 0x61c   :  { %v911_v9 = vsel %vm736_vm4, %v1855_v8, 0.0 }
 0x61d   :  { %912 = vadd.xlane.f32.xlu1 %v911_v9 }
 0x62e   :  { %916 = vrot.lane.b32.xlu1 %v655_v47, %s2043_s28 }
 0x62f   :  { %748 = vrot.lane.b32.xlu0 %v655_v47, %s2036_s4 }
 0x6a2   :  { %v745_v10 = vpop.xlane.xlu0 %744 }
 0x6a3   :  { %1856 = vrcp.f32 %v745_v10 }
 0x6a6   :  { %v913_v11 = vpop.xlane.xlu1 %912  ;;  %v749_v12 = vpop.permute.xlu0 %748 }
 0x6a7   :  { %1858 = vrcp.f32 %v913_v11  ;;  %1765 = vmatpush3.msk.msra.mxu1 %vm754_vm5, %v749_v12 }
 0x6a8   :  { %1774 = vmatprep.subr.mxu1 %v2033_v0 }
 0x6aa   :  { %v917_v15 = vpop.permute.xlu1 %916 }
 0x6b0   :  { %v1857_v13 = vpop.eup %1856 }
 0x6b1   :  { %v747_v14 = vmul.f32 %v1857_v13, %v1853_v6 }
 0x6b3   :  { %1767 = vmatmul.mubr.msk.f32.vlgmr.msra.gmra.mxu1 %vm750_vm6, %v747_v14 }
 0x6b4   :  { %v1859_v16 = vpop.eup %1858  ;;  %1775 = vmatpush3.msk.msra.mxu1 %vm754_vm5, %v917_v15  ;;  %1776 = vmatprep.mubr.msk.f32.mxu1 %vm2034_vm0, %v2033_v0 }
 0x6b5   :  { %1786 = vmatprep.subr.mxu1 %v2033_v0  ;;  %v915_v17 = vmul.f32 %v1859_v16, %v1855_v8 }
 0x6b7   :  { %1777 = vmatmul.mubr.msk.f32.vlgmr.msra.gmra.mxu1 %vm750_vm6, %v915_v17 }
 0x6b8   :  { %1787 = vmatpush3.msra.mxu1 %v1091_v18  ;;  %1794 = vmatprep.mubr.msk.f32.mxu1 %vm2034_vm0, %v2033_v0 }
 0x6b9   :  { %1788 = vmatprep.subr.mxu1 %v2033_v0 }
 0x6ba   :  { %1789 = vmatpush3.msra.mxu1 %v1090_v19 }
 0x6bb   :  { %1790 = vmatprep.subr.mxu1 %v2033_v0 }
 0x6bc   :  { %1791 = vmatpush3.msra.mxu1 %v1089_v20 }
 0x6bd   :  { %1792 = vmatprep.subr.mxu1 %v2033_v0 }
 0x6be   :  { %1793 = vmatpush3.msra.mxu1 %v1088_v22 }
 0x6bf   :  { %1795 = vmatmul.mubr.msk.f32.vlgmr.msra.gmra.mxu1 %vm99_vm1, %v1095_v21  ;;  %1807 = vmatprep.subr.mxu1 %v2033_v0 }
 0x6c0   :  { %1809 = vmatprep.mubr.msk.f32.mxu1 %vm2034_vm0, %v2033_v0 }
 0x773   :  { %v823_v5 = vpop.f32.mrf.mxu1 }
 0x775   :  { %v1768_v25 = vpop.f32.mrf.mxu1 }
 0x777   :  { %v989_v26 = vpop.f32.mrf.mxu1 }
 0x778   :  { %994 = vrot.lane.b32.xlu1 %v989_v26, %s2028_s25 }
 0x779   :  { %v1778_v27 = vpop.f32.mrf.mxu1 }
 0x77f   :  { %v1164_v28 = vpop.f32.mrf.mxu1 }
 0x780   :  { %1335 = vrot.lane.b32.xlu1 %v1164_v28, %s2041_s26  ;;  %1169 = vrot.lane.b32.xlu0 %v1164_v28, %s2035_s2 }
 0x781   :  { %v1796_v29 = vpop.f32.mrf.mxu1 }
 0x784   :  { %1333 = vrot.lane.b32.xlu0 %v1164_v28, %s2042_s27 }
 0x7ea   :  { %v995_v30 = vpop.permute.xlu1 %994 }
 0x7eb   :  { %v997_v31 = vsel %vm251_vm3, %v823_v5, %v995_v30 }
 0x7ec   :  { %1784 = vmatmul.mubr.msk.f32.vlgmr.msra.gmra.mxu0 %vm176_vm2, %v997_v31 }
 0x7ed   :  { %1799 = vmatprep.mubr.msk.f32.mxu0 %vm2034_vm0, %v2033_v0 }
 0x7f2   :  { %v1336_v32 = vpop.permute.xlu1 %1335  ;;  %v1170_v33 = vpop.permute.xlu0 %1169 }
 0x7f3   :  { %1798 = vmatpush3.xpose.msk.msra.mxu0 %vm251_vm3, %v1170_v33  ;;  %1808 = vmatpush3.xpose.msk.msra.mxu1 %vm251_vm3, %v1336_v32 }
 0x7f4   :  { %1802 = vmatprep.subr.mxu0 %v2033_v0  ;;  %1817 = vmatprep.subr.mxu1 %v2033_v0 }
 0x7f6   :  { %1800 = vmatmul.mubr.msk.f32.vlgmr.msra.gmra.mxu0 %vm251_vm3, %v1164_v28  ;;  %v1334_v34 = vpop.permute.xlu0 %1333 }
 0x7f7   :  { %1810 = vmatmul.mubr.msk.f32.vlgmr.msra.gmra.mxu1 %vm251_vm3, %v1334_v34  ;;  %1804 = vmatprep.mubr.msk.f32.mxu0 %vm2034_vm0, %v2033_v0 }
 0x7f8   :  { %1821 = vmatprep.mubr.msk.f32.mxu1 %vm2034_vm0, %v2033_v0  ;;  %1818 = vmatpush3.msra.mxu1 %v1094_v2 }
 0x7f9   :  { %1819 = vmatprep.subr.mxu1 %v2033_v0 }
 0x7fa   :  { %1820 = vmatpush3.msra.mxu1 %v1093_v3 }
 0x8ac   :  { %v2224_v35 = vpop.f32.mrf.mxu0 }
 0x8ad   :  { %v1079_v9 = vmul.f32 %v2224_v35, %v2224_v35 }
 0x8ae   :  { %v1785_v36 = vpop.f32.mrf.mxu0 }
 0x8af   :  { %v1080_v10 = vsel %vm1072_vm7, %v1079_v9, 0.0 }
 0x8b6   :  { %v1241_v37 = vpop.f32.mrf.mxu0 }
 0x8b7   :  { %v1407_v38 = vpop.f32.mrf.mxu1  ;;  %v1245_v39 = vsel %vm736_vm4, %v1241_v37, -inf }
 0x8b8   :  { %1246 = vmax.xlane.f32.xlu1 %v1245_v39  ;;  %v1801_v40 = vpop.f32.mrf.mxu0  ;;  %v1411_v41 = vsel %vm736_vm4, %v1407_v38, -inf }
 0x8b9   :  { %1412 = vmax.xlane.f32.xlu0 %v1411_v41  ;;  %v1811_v42 = vpop.f32.mrf.mxu1 }
 0x941   :  { %v1247_v43 = vpop.xlane.xlu1 %1246 }
 0x942   :  { %v1248_v44 = vsub.f32 %v1241_v37, %v1247_v43  ;;  %v1413_v45 = vpop.xlane.xlu0 %1412 }
 0x943   :  { %v1414_v46 = vsub.f32 %v1407_v38, %v1413_v45 }
 0x944   :  { %v1249_v47 = vmul.f32 1.442695, %v1248_v44 }
 0x945   :  { %v1415_v48 = vmul.f32 1.442695, %v1414_v46 }
 0x946   :  { %1860 = vpow2.f32 %v1249_v47 }
 0x947   :  { %1862 = vpow2.f32 %v1415_v48 }
 0x953   :  { %v1861_v49 = vpop.eup %1860 }
 0x954   :  { %v1863_v50 = vpop.eup %1862  ;;  %v1251_v51 = vsel %vm736_vm4, %v1861_v49, 0.0 }
 0x955   :  { %1252 = vadd.xlane.f32.xlu0 %v1251_v51  ;;  %v1417_v52 = vsel %vm736_vm4, %v1863_v50, 0.0 }
 0x956   :  { %1418 = vadd.xlane.f32.xlu1 %v1417_v52 }
 0x967   :  { %1422 = vrot.lane.b32.xlu1 %v1164_v28, %s2043_s28 }
 0x96b   :  { %1256 = vrot.lane.b32.xlu0 %v1164_v28, %s2036_s4 }
 0x98a   :  { %1074 = vadd.xlane.f32.xlu0 %v1073_v55 }
 0x98e   :  { %1579 = vadd.xlane.f32.xlu0 %v1578_v56 }
 0x9de   :  { %v1253_v57 = vpop.xlane.xlu0 %1252 }
 0x9df   :  { %1864 = vrcp.f32 %v1253_v57  ;;  %v1419_v58 = vpop.xlane.xlu1 %1418 }
 0x9e0   :  { %1866 = vrcp.f32 %v1419_v58 }
 0x9e2   :  { %v1257_v59 = vpop.permute.xlu0 %1256 }
 0x9e3   :  { %1803 = vmatpush3.msk.msra.mxu0 %vm754_vm5, %v1257_v59  ;;  %v1423_v63 = vpop.permute.xlu1 %1422 }
 0x9e4   :  { %1812 = vmatprep.subr.mxu0 %v2033_v0 }
 0x9ec   :  { %v1865_v60 = vpop.eup %1864 }
 0x9ed   :  { %v1255_v61 = vmul.f32 %v1865_v60, %v1861_v49  ;;  %v1867_v62 = vpop.eup %1866 }
 0x9ee   :  { %v1421_v1 = vmul.f32 %v1867_v62, %v1863_v50 }
 0x9ef   :  { %1805 = vmatmul.mubr.msk.f32.vlgmr.msra.gmra.mxu0 %vm750_vm6, %v1255_v61 }
 0x9f0   :  { %1813 = vmatpush3.msk.msra.mxu0 %vm754_vm5, %v1423_v63  ;;  %1814 = vmatprep.mubr.msk.f32.mxu0 %vm2034_vm0, %v2033_v0 }
 0x9f3   :  { %1815 = vmatmul.mubr.msk.f32.vlgmr.msra.gmra.mxu0 %vm750_vm6, %v1421_v1 }
 0xaaf   :  { %v1329_v4 = vpop.f32.mrf.mxu0 }
 0xab1   :  { %v1806_v6 = vpop.f32.mrf.mxu0 }
 0xab3   :  { %v1495_v7 = vpop.f32.mrf.mxu0 }
 0xab4   :  { %1500 = vrot.lane.b32.xlu1 %v1495_v7, %s2028_s25  ;;  %s1613_s25 = sshll.u32 %s2044_s29, 4  ;;  %s1614_s25 = int_to_ptr.vmem [resolvable:$true] %s1613_s25 }
 0xab5   :  { %v1816_v8 = vpop.f32.mrf.mxu0  ;;  %s1976_s30 = scalar_lea.vmem %s1614_s25, 128  ;;  %p1981_p12 = scmp.lt.s32.totalorder %s1614_s25, %s1614_s25 }
 0xab6   :  { %p1977_p11 = scmp.ne.s32.totalorder %s1614_s25, %s1976_s30  ;;  %p1982_p13 = scmp.lt.s32.totalorder %s1976_s30, %s1976_s30 }
 0xab8   :  { %p1983_p0 = por %p1982_p13, %p1981_p12 }
 0xaba   :  { %p1984_p1 = pnand %p1983_p0, %p1977_p11 }
 0xad8   :  { %1081 = vadd.xlane.f32.xlu1 %v1080_v10 }
 0xb26   :  { %v1501_v11 = vpop.permute.xlu1 %1500 }
 0xb27   :  { %v1503_v12 = vsel %vm251_vm3, %v1329_v4, %v1501_v11 }
 0xb28   :  { %1822 = vmatmul.mubr.msk.f32.vlgmr.msra.gmra.mxu1 %vm176_vm2, %v1503_v12 }
 0xbe8   :  { %v1573_v0 = vpop.f32.mrf.mxu1 }
 0xbe9   :  { %v1584_v13 = vmul.f32 %v1573_v0, %v1573_v0 }
 0xbea   :  { %v1823_v14 = vpop.f32.mrf.mxu1 }
 0xbeb   :  { %v1585_v15 = vsel %vm1072_vm7, %v1584_v13, 0.0 }
 0xbec   :  { %1586 = vadd.xlane.f32.xlu0 %v1585_v15 }
 0xbed   :  { %1987 = shalt.err (!%p1984_p1)
}
 0xbee   :  { %1616 = dma.vmem_to_hbm [thread:$0]  %s1614_s25, 128, %s2267_s6, [#allocation13]   ;;  %v1075_v16 = vpop.xlane.xlu0 %1074  ;;  %v1082_v17 = vpop.xlane.xlu1 %1081 }
 0xbef   :  { %v1076_v19 = vmax.f32 %v1075_v16, 1e-24  ;;  %v1083_v20 = vmax.f32 %v1082_v17, 1e-24  ;;  %s2045_s6 = smov [#allocation11]  }
 0xbf0   :  { %s1603_s9 = sshll.u32 %s2045_s6, 4  ;;  %s1604_s9 = int_to_ptr.vmem [resolvable:$true] %s1603_s9 }
 0xbf1   :  { %1868 = vrsqrt.f32 %v1076_v19  ;;  %s1996_s10 = scalar_lea.vmem %s1604_s9, 128  ;;  %p2001_p3 = scmp.lt.s32.totalorder %s1604_s9, %s1604_s9 }
 0xbf2   :  { %v1580_v18 = vpop.xlane.xlu0 %1579  ;;  %1870 = vrsqrt.f32 %v1083_v20  ;;  %p1997_p2 = scmp.ne.s32.totalorder %s1604_s9, %s1996_s10  ;;  %p2002_p4 = scmp.lt.s32.totalorder %s1996_s10, %s1996_s10 }
 0xbf3   :  { %v1581_v21 = vmax.f32 %v1580_v18, 1e-24 }
 0xbf4   :  { %p2003_p5 = por %p2002_p4, %p2001_p3 }
 0xbf5   :  { %1872 = vrsqrt.f32 %v1581_v21 }
 0xbf6   :  { %p2004_p6 = pnand %p2003_p5, %p1997_p2 }
 0xbfe   :  { %v1869_v24 = vpop.eup %1868 }
 0xbff   :  { %v1871_v5 = vpop.eup %1870  ;;  %v1078_v29 = vmul.f32 %v1869_v24, %v2178_v54 }
 0xc00   :  { %v1085_v27 = vmul.f32 %v1871_v5, %v2224_v35 }
 0xc02   :  { %v1873_v25 = vpop.eup %1872  ;;  %v1086_v32 = vadd.f32 %v1085_v27, %v1078_v29 }
 0xc03   :  { %v1583_v30 = vmul.f32 %v1873_v25, %v2178_v54 }
 0xc75   :  { %v1587_v22 = vpop.xlane.xlu0 %1586 }
 0xc76   :  { %v1588_v23 = vmax.f32 %v1587_v22, 1e-24 }
 0xc78   :  { %1874 = vrsqrt.f32 %v1588_v23 }
 0xc85   :  { %v1875_v26 = vpop.eup %1874 }
 0xc86   :  { %v1590_v28 = vmul.f32 %v1875_v26, %v1573_v0 }
 0xc88   :  { %v1592_v31 = vrot.slane %v1590_v28, 4 }
 0xc8a   :  { %v1594_v33 = vadd.f32 %v1592_v31, %v1583_v30 }
 0xc8c   :  { %v1595_v34 = vsel %vm754_vm5, %v1086_v32, %v1594_v33 }
 0xc8d   :  { %1596 = vst.msk [vmem:[#allocation11] sm:$0xff] %vm99_vm1, %v1595_v34 }
 0xc8e   :  { %2007 = shalt.err (!%p2004_p6)
}
 0xc8f   :  { %1606 = dma.vmem_to_hbm [thread:$0]  %s1604_s9, 128, %s2266_s5, [#allocation4]  }
 0xc90   :  { %2022 = dma.done.wait [#allocation4], 128  }
 0xc91   :  { %2023 = vsyncadd [#allocation4], 4294967168 }
 0xc92   :  { %2024 = dma.done.wait [#allocation13], 128  }
 0xc93   :  { %2025 = vsyncadd [#allocation13], 4294967168 }
 0xc94   :  { %1623 = vsyncpa [#allocation3], 1 }
 0xc95   :  { %1624 = vsyncpa [#allocation6], 1 }
 0xc96   :  { %1625 = vsyncpa [#allocation9], 1 }
 0xc97   :  { %1626 = vsyncpa [#allocation4], 1 }
 0xc98   :  { %1627 = vsyncpa [#allocation13], 1 }

</bundles_post_ra>
